<compile_context>
chip_gen: v5e
topology: v5e:2x2
jax: 0.10.0
libtpu: 0.0.40
codegen_flags: <defaults>
</compile_context>

<pallas_src>
import math
from functools import partial

import jax
import jax.numpy as jnp
from jax import lax
from jax.experimental import pallas as pl
from jax.experimental.pallas import tpu as pltpu

_LANE = 128
_SUBLANE = 8
_NOISE_LANE = 512            # lane width of the flattened noise-kernel view (multiple of 128)


def _ceil_to(n, m):
    return ((n + m - 1) // m) * m


def _vmem_capacity_bytes():
    """Per-core VMEM capacity; falls back to the smallest fleet value (v7x: 64 MiB/TC)."""
    try:
        cap = int(pltpu.get_tpu_info().vmem_capacity_bytes)
    except Exception:
        cap = 64 * 1024 * 1024
    return max(cap, 32 * 1024 * 1024)


def _largest_divisor(n, step, cap):
    """Largest multiple of `step` dividing n and <= cap (n must be a multiple of `step`)."""
    cap = max(step, (min(cap, n) // step) * step)
    r = cap
    while r >= step:
        if n % r == 0:
            return r
        r -= step
    return step


# ----------------------------------------------------------------------------
# Kernel 1: noising   noised[b] = input[b] + noise[b] * sigma[b]
#   Dense (8,128)-tiled view (B, rows, 512); sigma via scalar prefetch (SMEM).
# ----------------------------------------------------------------------------
def _noise_kernel(sigma_ref, x_ref, n_ref, o_ref):
    s = sigma_ref[pl.program_id(0)]                     # scalar from SMEM
    o_ref[...] = (x_ref[...] + n_ref[...] * s).astype(o_ref.dtype)


def get_noised_input(inp, noise, sigmas):
    B = inp.shape[0]
    N = math.prod(inp.shape[1:])
    dtype = inp.dtype
    itemsize = jnp.dtype(dtype).itemsize

    align = _NOISE_LANE * _SUBLANE                      # 4096 elems -> (8, 512) dense tiles
    n_pad = _ceil_to(N, align)

    xf = inp.reshape(B, N)
    nf = noise.reshape(B, N)
    if n_pad != N:
        pad = n_pad - N
        xf = jnp.pad(xf, ((0, 0), (0, pad)))
        nf = jnp.pad(nf, ((0, 0), (0, pad)))
    rows = n_pad // _NOISE_LANE                         # multiple of 8
    x3 = xf.reshape(B, rows, _NOISE_LANE)
    n3 = nf.reshape(B, rows, _NOISE_LANE)

    # Byte-based tile budget: 3 streaming operands x 2 pipeline buffers, ~2-4 MiB each.
    vmem_cap = _vmem_capacity_bytes()
    per_buf_bytes = max(_NOISE_LANE * _SUBLANE * itemsize, min(4 << 20, vmem_cap // 24))
    r_cap = max(_SUBLANE, per_buf_bytes // (_NOISE_LANE * itemsize))
    R = _largest_divisor(rows, _SUBLANE, r_cap)
    nk = rows // R

    blk = pl.BlockSpec((1, R, _NOISE_LANE), lambda b, k, sig: (b, k, 0))
    out = pl.pallas_call(
        _noise_kernel,
        out_shape=jax.ShapeDtypeStruct((B, rows, _NOISE_LANE), dtype),
        grid_spec=pltpu.PrefetchScalarGridSpec(
            num_scalar_prefetch=1,
            grid=(B, nk),
            in_specs=[blk, blk],
            out_specs=blk,
        ),
        compiler_params=pltpu.CompilerParams(
            dimension_semantics=("parallel", "parallel"),
            vmem_limit_bytes=int(vmem_cap // 2),
        ),
    )(sigmas.astype(jnp.float32), x3, n3)

    out = out.reshape(B, n_pad)
    if n_pad != N:
        out = out[:, :N]
    return out.reshape(inp.shape)


# ----------------------------------------------------------------------------
# Kernel 2: weighted L2 loss with lambda_lower / lambda_upper half-image weighting.
#   View (B, 2C, (H//2)*W): even rows = upper half of a channel, odd rows = lower half.
#   grid = (B, n_split, chunks): batch & split parallel; chunk is the reduction axis.
#   Per step: elementwise diff^2 add into a lane-wide f32 scratch.  Finalize: iota row
#   weights, full reduce, scale by w[b]/(C*H*W), single (1,1,1) store.
# ----------------------------------------------------------------------------
def _l2_loss_kernel(w_ref, mo_ref, tgt_ref, o_ref, acc_ref, *,
                    lambda_lower, lambda_upper, inv_n):
    b = pl.program_id(0)
    k = pl.program_id(2)
    last_k = pl.num_programs(2) - 1

    @pl.when(k == 0)
    def _init():
        acc_ref[...] = jnp.zeros_like(acc_ref)

    diff = mo_ref[...].astype(jnp.float32) - tgt_ref[...].astype(jnp.float32)
    acc_ref[...] += diff * diff                         # pure VPU work, hides under DMA

    @pl.when(k == last_k)
    def _finalize():
        rows = acc_ref.shape[1]
        row_idx = lax.broadcasted_iota(jnp.int32, (1, rows, 1), 1)
        row_w = jnp.where(row_idx % 2 == 0,
                          jnp.float32(lambda_upper), jnp.float32(lambda_lower))
        total = jnp.sum(acc_ref[...] * row_w, keepdims=True)          # (1,1,1)
        o_ref[...] = total * (w_ref[b] * inv_n)


def weighted_l2_loss(model_output, target, w, lambda_lower, lambda_upper):
    """w: per-batch scalar EDM weighting, shape (B,). Returns per-batch loss, shape (B,)."""
    B, C, H, W = target.shape
    if H % 2 != 0:
        # TODO(synk): odd H (middle row belongs to the lower half in PyTorch) not handled.
        raise ValueError("weighted_l2_loss requires even H (standard for diffusion latents).")
    HW2 = (H // 2) * W
    rows = 2 * C
    hw2_pad = _ceil_to(HW2, _LANE)

    mo3 = model_output.reshape(B, rows, HW2)            # contiguous view
    tg3 = target.reshape(B, rows, HW2)
    if hw2_pad != HW2:
        pad = hw2_pad - HW2
        mo3 = jnp.pad(mo3, ((0, 0), (0, 0), (0, pad)))  # zero pad -> diff 0 -> contributes 0
        tg3 = jnp.pad(tg3, ((0, 0), (0, 0), (0, pad)))

    itemsize = jnp.dtype(target.dtype).itemsize
    vmem_cap = _vmem_capacity_bytes()
    # 2 streaming operands x 2 buffers (+ f32 scratch of one tile), ~4 MiB per buffer.
    per_buf_bytes = max(rows * _LANE * itemsize, min(4 << 20, vmem_cap // 16))
    chunk_cap = max(_LANE, per_buf_bytes // (rows * itemsize))
    chunk = _largest_divisor(hw2_pad, _LANE, chunk_cap)
    nk = hw2_pad // chunk
    n_split = 2 if (nk % 2 == 0 and nk >= 2) else 1     # second parallel axis for megacore
    nk_s = nk // n_split

    in_blk = pl.BlockSpec((1, rows, chunk),
                          lambda b, s, k, wref: (b, 0, s * nk_s + k))
    out_blk = pl.BlockSpec((1, 1, 1), lambda b, s, k, wref: (b, s, 0))

    partials = pl.pallas_call(
        partial(_l2_loss_kernel,
                lambda_lower=float(lambda_lower),
                lambda_upper=float(lambda_upper),
                inv_n=1.0 / float(C * H * W)),
        out_shape=jax.ShapeDtypeStruct((B, n_split, 1), jnp.float32),
        grid_spec=pltpu.PrefetchScalarGridSpec(
            num_scalar_prefetch=1,
            grid=(B, n_split, nk_s),
            in_specs=[in_blk, in_blk],
            out_specs=out_blk,
            scratch_shapes=[pltpu.VMEM((1, rows, chunk), jnp.float32)],
        ),
        compiler_params=pltpu.CompilerParams(
            dimension_semantics=("parallel", "parallel", "arbitrary"),
            vmem_limit_bytes=int(vmem_cap // 2),
        ),
    )(w.astype(jnp.float32), mo3, tg3)
    return jnp.sum(partials.reshape(B, n_split), axis=1)


# ----------------------------------------------------------------------------
# Plain-JAX glue (config-instantiated pieces of the module)
# ----------------------------------------------------------------------------
def edm_sigma_sampler(key, n, p_mean=-1.2, p_std=1.2):
    # sigma_sampler_config -> EDM log-normal sampler
    return jnp.exp(p_mean + p_std * jax.random.normal(key, (n,), dtype=jnp.float32))


def edm_loss_weighting(sigmas, sigma_data=0.5):
    # loss_weighting_config -> EDM weighting
    return (sigmas ** 2 + sigma_data ** 2) / ((sigmas * sigma_data) ** 2)


def synthetic_denoiser(noised_input, sigmas_bc):
    # TODO(synk): real `denoiser(network, ...)` is an external module; deterministic stand-in.
    return noised_input / (1.0 + sigmas_bc ** 2)


def standard_diffusion_loss_forward(inp, key, *, loss_type="l2",
                                    lambda_lower=0.5, lambda_upper=2.0):
    assert loss_type == "l2"
    B = inp.shape[0]
    k_sig, k_noise = jax.random.split(key)

    sigmas = edm_sigma_sampler(k_sig, B)                         # (B,)
    noise = jax.random.normal(k_noise, inp.shape, dtype=inp.dtype)
    sigmas_bc = sigmas.reshape(B, 1, 1, 1)                       # append_dims(sigmas, 4)

    # --- Pallas kernel 1: noising ---
    noised_input = get_noised_input(inp, noise, sigmas)

    model_output = synthetic_denoiser(noised_input, sigmas_bc)

    w = edm_loss_weighting(sigmas)                               # (B,) scalar weights

    # --- Pallas kernel 2: weighted L2 loss per batch element ---
    loss = weighted_l2_loss(model_output, inp, w, lambda_lower, lambda_upper)

    loss_dict = {"l2": loss, "loss": loss}
    return loss_dict, noised_input, model_output, sigmas, noise, w.reshape(B, 1, 1, 1)


# ----------------------------------------------------------------------------
# Reference (pure JAX semantics mirroring the PyTorch code) for validation
# ----------------------------------------------------------------------------
def reference_loss(model_output, target, w, lambda_lower, lambda_upper):
    B, C, H, W = target.shape
    w_full = jnp.broadcast_to(w, target.shape)
    if lambda_lower != 1.0:
        wl = jnp.ones_like(model_output).at[:, :, H // 2:].multiply(lambda_lower)
        w_full = wl * w_full
    if lambda_upper != 1.0:
        wu = jnp.ones_like(model_output).at[:, :, : H // 2].multiply(lambda_upper)
        w_full = wu * w_full
    return jnp.mean((w_full * (model_output - target) ** 2).reshape(B, -1), axis=1)


def _run_and_check(shape, key, lambda_lower=0.5, lambda_upper=2.0):
    k_in, k_fwd = jax.random.split(key)
    x = jax.random.normal(k_in, shape, dtype=jnp.float32)
    loss_dict, noised, model_out, sigmas, noise, w_bc = standard_diffusion_loss_forward(
        x, k_fwd, lambda_lower=lambda_lower, lambda_upper=lambda_upper)
    loss = jax.block_until_ready(loss_dict["loss"])

    B = shape[0]
    ref_noised = x + noise * sigmas.reshape(B, 1, 1, 1)
    ref_loss = reference_loss(model_out, x, w_bc, lambda_lower, lambda_upper)
    assert loss.shape == (B,)
    assert jnp.allclose(noised, ref_noised, atol=1e-5, rtol=1e-5)
    assert jnp.allclose(loss, ref_loss, atol=1e-5, rtol=1e-4)


if __name__ == "__main__":
    key = jax.random.PRNGKey(0)
    k0, k1 = jax.random.split(key)

    # Main small example (lane-aligned latent-like shape).
    _run_and_check((2, 4, 16, 16), k0)

    # Misaligned shape to exercise the zero-padding path ((H//2)*W not a multiple of 128).
    _run_and_check((2, 4, 10, 12), k1)

    print("KERNEL_OK")
</pallas_src>

<mosaic_0001>
module attributes {stable_mosaic.version = 11 : i64} {
  func.func @_noise_kernel(%arg0: i32, %arg1: i32, %arg2: memref<2xf32, #tpu.memory_space<smem>>, %arg3: memref<1x8x512xf32, #tpu.memory_space<vmem>>, %arg4: memref<1x8x512xf32, #tpu.memory_space<vmem>>, %arg5: memref<1x8x512xf32, #tpu.memory_space<vmem>>) attributes {dimension_semantics = [#tpu.dimension_semantics<parallel>, #tpu.dimension_semantics<parallel>], iteration_bounds = array<i64: 2, 1>, scalar_prefetch = 1 : i64, scratch_operands = 0 : i64, tpu.core_type = #tpu.core_type<tc>, window_params = [{transform_indices = @transform_0, window_bounds = array<i64: 1, 8, 512>}, {transform_indices = @transform_1, window_bounds = array<i64: 1, 8, 512>}, {transform_indices = @transform_2, window_bounds = array<i64: 1, 8, 512>}]} {
    %0 = arith.index_cast %arg0 : i32 to index
    %1 = memref.load %arg2[%0] : memref<2xf32, #tpu.memory_space<smem>>
    %c0 = arith.constant 0 : index
    %c0_0 = arith.constant 0 : index
    %c0_1 = arith.constant 0 : index
    %2 = vector.load %arg3[%c0, %c0_0, %c0_1] : memref<1x8x512xf32, #tpu.memory_space<vmem>>, vector<1x8x512xf32>
    %c0_2 = arith.constant 0 : index
    %c0_3 = arith.constant 0 : index
    %c0_4 = arith.constant 0 : index
    %3 = vector.load %arg4[%c0_2, %c0_3, %c0_4] : memref<1x8x512xf32, #tpu.memory_space<vmem>>, vector<1x8x512xf32>
    %4 = vector.broadcast %1 : f32 to vector<1x8x512xf32>
    %5 = arith.mulf %3, %4 : vector<1x8x512xf32>
    %6 = arith.addf %2, %5 : vector<1x8x512xf32>
    %c0_5 = arith.constant 0 : index
    %c0_6 = arith.constant 0 : index
    %c0_7 = arith.constant 0 : index
    %7 = vector.load %arg5[%c0_5, %c0_6, %c0_7] : memref<1x8x512xf32, #tpu.memory_space<vmem>>, vector<1x8x512xf32>
    tpu.vector_store %arg5[%c0_5, %c0_6, %c0_7], %6 {strides = array<i32>} : memref<1x8x512xf32, #tpu.memory_space<vmem>>, vector<1x8x512xf32>,
    return
  }
  func.func @transform_0(%arg0: i32, %arg1: i32, %arg2: memref<2xf32, #tpu.memory_space<smem>>) -> (i32, i32, i32) {
    %c0_i32 = arith.constant 0 : i32
    %c0_i32_0 = arith.constant 0 : i32
    return %arg0, %arg1, %c0_i32 : i32, i32, i32
  }
  func.func @transform_1(%arg0: i32, %arg1: i32, %arg2: memref<2xf32, #tpu.memory_space<smem>>) -> (i32, i32, i32) {
    %c0_i32 = arith.constant 0 : i32
    %c0_i32_0 = arith.constant 0 : i32
    return %arg0, %arg1, %c0_i32 : i32, i32, i32
  }
  func.func @transform_2(%arg0: i32, %arg1: i32, %arg2: memref<2xf32, #tpu.memory_space<smem>>) -> (i32, i32, i32) {
    %c0_i32 = arith.constant 0 : i32
    %c0_i32_0 = arith.constant 0 : i32
    return %arg0, %arg1, %c0_i32 : i32, i32, i32
  }
}

</mosaic_0001>

<bundles_post_ra>
// kernel: tpu_custom_call.1
= control target key start
LH: loop header
LB: loop body
LE: loop exit
PB: predicated region body
PF: predicated region fallthrough
CT: control target
= control target key end

     0   :  { %s636_s15 = smov [#allocation3]   ;;  %s789_s0 = inlined_call_operand.hbm [shape: f32[2], index: 0, kind: input, shape index: {}]   ;;  %s790_s1 = inlined_call_operand.hbm [shape: f32[2,8,512], index: 1, kind: input, shape index: {}]   ;;  %s791_s2 = inlined_call_operand.hbm [shape: f32[2,8,512], index: 2, kind: input, shape index: {}]   ;;  %s792_s3 = inlined_call_operand.hbm [shape: f32[2,8,512], index: 3, kind: output, shape index: {}]  }
   0x1   :  { %s9_s14 = sshll.u32 %s789_s0, 4  ;;  %s10_s14 = int_to_ptr.hbm [resolvable:$true] %s9_s14 }
   0x2   :  { %12 = dma.hbm_to_smem %s10_s14, 16, %s636_s15, [#allocation2] }
   0x3   :  { %598 = dma.done.wait [#allocation2], 16 }
   0x4   :  { %599 = vsyncadd [#allocation2], 4294967280 }
   0x5   :  { %15 = sfence }
   0x6   :  { %16 = vsyncpa [#allocation5], 0 }
   0x7   :  { %18 = vsyncpa [#allocation5 + $0x1], 0 }
   0x8   :  { %19 = vsyncpa [#allocation8], 0 }
   0x9   :  { %21 = vsyncpa [#allocation8 + $0x1], 0 }
   0xa   :  { %22 = vsyncpa [#allocation6], 0 }
   0xb   :  { %24 = vsyncpa [#allocation6 + $0x1], 0  ;;  %s660_s16 = smov 0   ;;  %s662_s17 = smov 0  }
   0xc   :  { %s664_s18 = smov 0   ;;  %s666_s19 = smov 0  }
   0xd   :  { %s668_s0 = smov 0   ;;  %s670_s20 = smov 0  }
   0xe LB: > { %s384_s21 = sadd.s32 4294967295, %s634_s20   ;;  %s385_s22 = sadd.s32 4294967294, %s634_s20   ;;  %s634_s20 = sphi %s670_s20, %s30_s20   ;;  %s630_s0 = sphi %s668_s0, %s801_s0   ;;  %s626_s19 = sphi %s666_s19, %s800_s19   ;;  %s622_s18 = sphi %s664_s18, %s799_s18   ;;  %s618_s17 = sphi %s662_s17, %s798_s17   ;;  %s614_s16 = sphi %s660_s16, %s797_s16  }
   0xf   : > { %s42_s23 = sadd.s32 1, %s630_s0  ;;  %s51_s24 = sadd.s32 1, %s622_s18 }
  0x10   : > { %p44_p0 = scmp.ge.s32.totalorder %s42_s23, 2  ;;  %p58_p1 = scmp.ne.s32.totalorder %s622_s18, %s618_s17 }
  0x11   : > { %p59_p2 = scmp.eq.s32.totalorder %s634_s20, 0  ;;  %p64_p3 = scmp.ne.s32.totalorder %s618_s17, %s614_s16 }
  0x12   : > { %s803_s23 = smov (%p44_p0, %s42_s23), 0  ;;  %p65_p5 = scmp.eq.s32.totalorder %s384_s21, 0 }
  0x13   : > { %p701_p4 = por %p59_p2, %p58_p1  ;;  %s46_s26 = ssub.s32 %s630_s0, %s803_s23 }
  0x14   : > { %p118_p6 = scmp.eq.s32.totalorder %s384_s21, 1  ;;  %p49_p7 = scmp.eq.s32.totalorder %s46_s26, 0 }
  0x15   : > { %p707_p8 = por %p65_p5, %p64_p3  ;;  %p124_p10 = scmp.eq.s32.totalorder %s385_s22, 1 }
  0x16   : > { %p711_p9 = por %p118_p6, %p58_p1  ;;  %p387_p12 = scmp.ge.s32.totalorder %s634_s20, 2 }
  0x17   : > { %s716_s29 = scalar_select %p49_p7, %s622_s18, %s51_s24  }
  0x18   : > { %p718_p11 = por %p124_p10, %p64_p3  ;;  %p423_p13 = scmp.lt.s32.totalorder %s634_s20, 2 }
  0x19   : > { %s144_s4 = sand.u32 1, %s622_s18   ;;  %s403_s6 = sshll.u32 %s630_s0, 5 }
  0x1a   : > { %s388_s5 = sshll.u32 %s144_s4, 5  ;;  %s155_s9 = scalar_lea.hbm %s790_s1, %s403_s6 }
  0x1b   : > { %s148_s10 = scalar_lea.vmem [#allocation4], %s388_s5  ;;  %s157_s12 = sshll.u32 %s155_s9, 4  ;;  %s158_s12 = int_to_ptr.hbm [resolvable:$true] %s157_s12 }
  0x1c   : > { %s159_s11 = sshll.u32 %s148_s10, 4  ;;  %p413_p0 = pnand %p423_p13, %p701_p4  ;;  %s160_s11 = int_to_ptr.vmem [resolvable:$true] %s159_s11 }
  0x1d   : > { %p394_p1 = scmp.ge.s32.totalorder %s634_s20, 1  ;;  %p186_p2 = scmp.lt.s32.totalorder %s634_s20, 3 }
  0x1e   : > { %s145_s13 = scalar_lea.sflag [#allocation5], %s144_s4  ;;  %s177_s21 = scalar_lea.hbm %s791_s2, %s403_s6 }
  0x1f   : > { %415 = dma.hbm_to_vmem [thread:$0]  (!%p413_p0), %s158_s12, 512, %s160_s11, %s145_s13  }
  0x20   : > { %p187_p3 = pnand %p394_p1, %p186_p2  ;;  %s170_s22 = scalar_lea.vmem [#allocation7], %s388_s5 }
  0x21   : > { %s181_s24 = sshll.u32 %s170_s22, 4  ;;  %s179_s26 = sshll.u32 %s177_s21, 4  ;;  %s182_s24 = int_to_ptr.vmem [resolvable:$true] %s181_s24  ;;  %s180_s26 = int_to_ptr.hbm [resolvable:$true] %s179_s26 }
  0x22   : > { %s167_s7 = scalar_lea.sflag [#allocation8], %s144_s4  ;;  %190 = sbr.rel (%p187_p3) target bundleno = 59 (0x3b), region = 28 }
  0x23   : > { %418 = dma.hbm_to_vmem [thread:$0]  (!%p413_p0), %s180_s26, 512, %s182_s24, %s167_s7  }
  0x24   : > { %s737_s25 = sand.u32 (!%p187_p3), 1, %s618_s17  }
  0x25   : > { %s395_s8 = sshll.u32 (!%p187_p3), %s737_s25, 5  ;;  %s193_s9 = scalar_lea.sflag (!%p187_p3), [#allocation5], %s737_s25 }
  0x26   : > { %s196_s10 = scalar_lea.vmem (!%p187_p3), [#allocation4], %s395_s8 }
  0x27   : > { %601 = dma.done.wait (%p707_p8), %s193_s9, 512  }
  0x28   : > { %603 = vsyncadd (%p707_p8), %s193_s9, 4294966784  ;;  %s203_s5 = scalar_lea.sflag [#allocation8], %s737_s25  ;;  %s206_s4 = scalar_lea.vmem [#allocation7], %s395_s8 }
  0x29   : > { %605 = dma.done.wait (%p707_p8), %s203_s5, 512  }
  0x2a   : > { %607 = vsyncadd (%p707_p8), %s203_s5, 4294966784  ;;  %s233_s6 = sld [smem:[#allocation3 + %s626_s19]]  ;;  %s405_s11 = sshll.u32 %s626_s19, 5  ;;  %v234_v0 = vld [vmem:[%s196_s10] sm:$0xff]  ;;  %v235_v3 = vld [vmem:[%s196_s10 + $0x8] sm:$0xff] }
  0x2b   : > { %v238_v1 = vld [vmem:[%s206_s4] sm:$0xff]  ;;  %s269_s14 = scalar_lea.hbm %s792_s3, %s405_s11  ;;  %v239_v5 = vld [vmem:[%s206_s4 + $0x8] sm:$0xff]  ;;  %v236_v6 = vld [vmem:[%s196_s10 + $0x10] sm:$0xff]  ;;  %s232_s27 = scalar_lea.vmem [#allocation9], %s395_s8 }
  0x2c   : > { %v240_v7 = vld [vmem:[%s206_s4 + $0x10] sm:$0xff]  ;;  %v237_v10 = vld [vmem:[%s196_s10 + $0x18] sm:$0xff]  ;;  %s271_s19 = sshll.u32 %s232_s27, 4  ;;  %s273_s15 = sshll.u32 %s269_s14, 4  ;;  %s272_s19 = int_to_ptr.vmem [resolvable:$true] %s271_s19  ;;  %s274_s15 = int_to_ptr.hbm [resolvable:$true] %s273_s15 }
  0x2d   : > { %v241_v11 = vld [vmem:[%s206_s4 + $0x18] sm:$0xff]  ;;  %s256_s21 = scalar_lea.sflag [#allocation6], %s737_s25  ;;  %s560_s22 = sshra.s32 %s274_s15, 4  ;;  %s561_s22 = int_to_ptr.hbm [resolvable:$true] %s560_s22 }
  0x2e   : > { %s562_s24 = scalar_lea.hbm %s561_s22, 32  ;;  %s566_s8 = scalar_lea.hbm %s792_s3, 64 }
  0x2f   : > { %p563_p4 = scmp.ne.s32.totalorder %s561_s22, %s562_s24  ;;  %p567_p7 = scmp.lt.s32.totalorder %s561_s22, %s792_s3 }
  0x30   : > { %v242_v2 = vstv %s233_s6  ;;  %p568_p8 = scmp.lt.s32.totalorder %s566_s8, %s562_s24 }
  0x31   : > { %v243_v4 = vmul.f32 %v242_v2, %v238_v1  ;;  %v244_v8 = vmul.f32 %v242_v2, %v239_v5  ;;  %v245_v9 = vmul.f32 %v242_v2, %v240_v7  ;;  %v246_v13 = vmul.f32 %v242_v2, %v241_v11  ;;  %p564_p5 = pnand %p563_p4, %p711_p9 }
  0x32   : > { %p569_p10 = por %p568_p8, %p567_p7 }
  0x33   : > { %v247_v12 = vadd.f32 %v243_v4, %v234_v0  ;;  %v248_v14 = vadd.f32 %v244_v8, %v235_v3  ;;  %v249_v15 = vadd.f32 %v245_v9, %v236_v6  ;;  %v250_v16 = vadd.f32 %v246_v13, %v237_v10  ;;  %p565_p6 = pneg %p564_p5 }
  0x35   : > { %251 = vst [vmem:[%s232_s27] sm:$0xff] %v247_v12  ;;  %p570_p13 = pnand %p569_p10, %p565_p6 }
  0x36   : > { %252 = vst [vmem:[%s232_s27 + $0x8] sm:$0xff] %v248_v14 }
  0x37   : > { %253 = vst [vmem:[%s232_s27 + $0x10] sm:$0xff] %v249_v15 }
  0x38   : > { %254 = vst [vmem:[%s232_s27 + $0x18] sm:$0xff] %v250_v16 }
  0x39   : > { %573 = shalt.err (!%p570_p13)
}
  0x3a   : > { %410 = dma.vmem_to_hbm [thread:$0]  (%p711_p9), %s272_s19, 512, %s274_s15, %s256_s21  }
  0x3b PF: > { %s285_s25 = sand.u32 1, %s614_s16   ;;  %p420_p0 = pnand %p387_p12, %p718_p11 }
  0x3c   : > { %s286_s5 = scalar_lea.sflag [#allocation6], %s285_s25 }
  0x3d   : > { %p421_p1 = pneg %p420_p0 }
  0x3f   : > { %609 = dma.done.wait (%p421_p1), %s286_s5, 512  }
  0x40   : > { %611 = vsyncadd (%p421_p1), %s286_s5, 4294966784  ;;  %s30_s20 = sadd.s32 1, %s634_s20   ;;  %s797_s16 = smov %s618_s17 }
  0x41   : > { %p27_p2 = scmp.ge.s32.totalorder %s30_s20, 4   ;;  %s798_s17 = smov %s622_s18 }
  0x42   : > { %s799_s18 = smov %s716_s29  ;;  %s800_s19 = smov %s630_s0 }
  0x43   : > { %s801_s0 = smov %s803_s23  ;;  %29 = sbr.rel (!%p27_p2) target bundleno = 14 (0xe), region = 86 }
  0x48   :  { %292 = vsyncpa [#allocation5], 1 }
  0x49   :  { %294 = vsyncpa [#allocation5 + $0x1], 1 }
  0x4a   :  { %295 = vsyncpa [#allocation8], 1 }
  0x4b   :  { %297 = vsyncpa [#allocation8 + $0x1], 1 }
  0x4c   :  { %298 = vsyncpa [#allocation6], 1 }
  0x4d   :  { %300 = vsyncpa [#allocation6 + $0x1], 1 }

</bundles_post_ra>
